<compile_context>
chip_gen: v6e
topology: v6e:2x2x1
jax: 0.10.0
libtpu: 0.0.40
codegen_flags: <defaults>
</compile_context>

<pallas_src>
import functools

import jax
import jax.numpy as jnp
from jax import lax
from jax.experimental import pallas as pl
from jax.experimental.pallas import tpu as pltpu


def _merge_local_global_kernel(xl_ref, xg_ref, w_ref, b_ref, m_ref, o_ref,
                               patch_ref, *, H, W, K, c_local, c_global):
    """One batch element: fused concat -> KxK conv -> folded BN -> ReLU.

    xl_ref    : (1, c_local,  HW)  local context, spatial flattened on lanes
    xg_ref    : (1, c_global, HW)  global context
    w_ref     : (Cout, K*K*Cin)    BN-folded weight, tap-major / channel-minor
    b_ref     : (Cout, 1)          BN-folded bias
    m_ref     : (K*K, HW)          0/1 boundary masks, one row per tap
    o_ref     : (1, Cout, HW)
    patch_ref : (K*K*Cin, HW)      im2col scratch (VMEM)
    """
    HW = H * W
    pad = K // 2
    cin = c_local + c_global

    # Fused channel concat (torch.cat order: [local..., global...]) in VMEM.
    x = jnp.concatenate([xl_ref[0], xg_ref[0]], axis=0)        # (cin, HW)

    # Build im2col with lane rolls (XLU) + boundary masks (VPU):
    # patch[(kh*K+kw)*cin + ci, i] = x[ci, i + dh*W + dw], 0 at image borders.
    for kh in range(K):
        for kw in range(K):
            dh, dw = kh - pad, kw - pad
            offset = dh * W + dw
            shift = (-offset) % HW
            tap = kh * K + kw
            xs = pltpu.roll(x, shift, 1) if shift != 0 else x
            if dh != 0 or dw != 0:
                xs = xs * m_ref[tap:tap + 1, :]                # (1, HW) 0/1
            patch_ref[tap * cin:(tap + 1) * cin, :] = xs

    # Single fat MXU contraction over all taps and input channels.
    acc = jnp.dot(w_ref[...], patch_ref[...],
                  preferred_element_type=jnp.float32)          # (Cout, HW)
    acc = acc + b_ref[...]                                     # folded BN bias
    o_ref[0] = jnp.maximum(acc, 0.0).astype(o_ref.dtype)       # ReLU


def merge_local_global_forward(local_ctx, global_ctx, weight,
                               gamma, beta, running_mean, running_var,
                               eps=1e-5):
    N, c_l, H, W = local_ctx.shape
    n2, c_g, h2, w2 = global_ctx.shape
    assert (n2, h2, w2) == (N, H, W)
    cout, cin, K, K2 = weight.shape
    assert K == K2 and cin == c_l + c_g
    pad = K // 2
    HW = H * W

    # Fold inference BatchNorm into the conv weight / bias.
    scale = gamma * lax.rsqrt(running_var + eps)               # (Cout,)
    w_folded = weight * scale[:, None, None, None]
    bias = (beta - running_mean * scale).reshape(cout, 1)

    # (Cout, Cin, K, K) -> (Cout, K*K*Cin): tap-major, channel-minor.
    # Channel order within a tap is [local..., global...] == torch.cat order.
    w2d = jnp.transpose(w_folded, (0, 2, 3, 1)).reshape(cout, K * K * cin)

    # Precomputed 0/1 boundary masks for every tap (tiny: K*K x HW).
    hw = jnp.arange(HW, dtype=jnp.int32)
    h_idx, w_idx = hw // W, hw % W
    masks = []
    for kh in range(K):
        for kw in range(K):
            dh, dw = kh - pad, kw - pad
            masks.append((h_idx + dh >= 0) & (h_idx + dh < H) &
                         (w_idx + dw >= 0) & (w_idx + dw < W))
    masks = jnp.stack(masks).astype(jnp.float32)               # (K*K, HW)

    # Lane-dense layout: just flatten spatial (no pad / transpose glue).
    xl = local_ctx.reshape(N, c_l, HW)
    xg = global_ctx.reshape(N, c_g, HW)

    kernel = functools.partial(_merge_local_global_kernel,
                               H=H, W=W, K=K, c_local=c_l, c_global=c_g)

    # TODO(synk): for large H*W / Cin, add an H-tile grid axis with halo rows;
    # full-image-per-batch-step is well within VMEM at these shapes.
    out = pl.pallas_call(
        kernel,
        out_shape=jax.ShapeDtypeStruct((N, cout, HW), local_ctx.dtype),
        grid_spec=pltpu.PrefetchScalarGridSpec(
            num_scalar_prefetch=0,
            grid=(N,),
            in_specs=[
                pl.BlockSpec((1, c_l, HW), lambda n: (n, 0, 0)),
                pl.BlockSpec((1, c_g, HW), lambda n: (n, 0, 0)),
                # Constant block indices -> fetched once, not per grid step.
                pl.BlockSpec((cout, K * K * cin), lambda n: (0, 0)),
                pl.BlockSpec((cout, 1), lambda n: (0, 0)),
                pl.BlockSpec((K * K, HW), lambda n: (0, 0)),
            ],
            out_specs=pl.BlockSpec((1, cout, HW), lambda n: (n, 0, 0)),
            scratch_shapes=[pltpu.VMEM((K * K * cin, HW), jnp.float32)],
        ),
        compiler_params=pltpu.CompilerParams(
            dimension_semantics=("parallel",)),
    )(xl, xg, w2d, bias, masks)

    return out.reshape(N, cout, H, W)


class MergeLocalGlobalPallas:
    """MergeLocalGlobal: cat(local, global) -> Conv3x3(bias=False) -> BN -> ReLU."""

    def __init__(self, inplanes, planes, key=None, eps=1e-5):
        # TODO(synk): BatchNorm is applied in inference mode (running stats
        # folded into the conv); training-mode batch statistics not implemented.
        if key is None:
            key = jax.random.PRNGKey(0)
        kw, kg, kb, km, kv = jax.random.split(key, 5)
        fan_in = inplanes * 3 * 3
        self.weight = (jax.random.normal(kw, (planes, inplanes, 3, 3),
                                         jnp.float32) * (1.0 / fan_in) ** 0.5)
        self.gamma = 1.0 + 0.1 * jax.random.normal(kg, (planes,), jnp.float32)
        self.beta = 0.1 * jax.random.normal(kb, (planes,), jnp.float32)
        self.running_mean = 0.1 * jax.random.normal(km, (planes,), jnp.float32)
        self.running_var = jax.random.uniform(kv, (planes,), jnp.float32,
                                              minval=0.5, maxval=1.5)
        self.eps = eps

    def __call__(self, local_context, global_context):
        return merge_local_global_forward(
            local_context, global_context, self.weight, self.gamma, self.beta,
            self.running_mean, self.running_var, self.eps)


def _reference_forward(local_ctx, global_ctx, weight, gamma, beta,
                       running_mean, running_var, eps):
    x = jnp.concatenate((local_ctx, global_ctx), axis=1)
    pad = weight.shape[-1] // 2
    y = lax.conv_general_dilated(
        x, weight, window_strides=(1, 1), padding=[(pad, pad), (pad, pad)],
        dimension_numbers=("NCHW", "OIHW", "NCHW"))
    scale = gamma * lax.rsqrt(running_var + eps)
    shift = beta - running_mean * scale
    y = y * scale[None, :, None, None] + shift[None, :, None, None]
    return jnp.maximum(y, 0.0)


if __name__ == "__main__":
    key = jax.random.PRNGKey(0)
    k_l, k_g, k_p = jax.random.split(key, 3)

    N, C_local, C_global, H, W = 2, 16, 16, 16, 16
    planes = 16
    inplanes = C_local + C_global

    local_ctx = jax.random.normal(k_l, (N, C_local, H, W), jnp.float32)
    global_ctx = jax.random.normal(k_g, (N, C_global, H, W), jnp.float32)

    mod = MergeLocalGlobalPallas(inplanes, planes, key=k_p)
    y = jax.block_until_ready(mod(local_ctx, global_ctx))
    assert y.shape == (N, planes, H, W), y.shape

    y_ref = jax.block_until_ready(_reference_forward(
        local_ctx, global_ctx, mod.weight, mod.gamma, mod.beta,
        mod.running_mean, mod.running_var, mod.eps))
    max_err = float(jnp.max(jnp.abs(y - y_ref)))
    assert jnp.allclose(y, y_ref, rtol=2e-3, atol=2e-3), max_err

    print("KERNEL_OK")
</pallas_src>

<mosaic_0001>
module attributes {stable_mosaic.version = 11 : i64} {
  func.func @_merge_local_global_kernel(%arg0: i32, %arg1: memref<1x16x256xf32, #tpu.memory_space<vmem>>, %arg2: memref<1x16x256xf32, #tpu.memory_space<vmem>>, %arg3: memref<16x288xf32, #tpu.memory_space<vmem>>, %arg4: memref<16x1xf32, #tpu.memory_space<vmem>>, %arg5: memref<9x256xf32, #tpu.memory_space<vmem>>, %arg6: memref<1x16x256xf32, #tpu.memory_space<vmem>>, %arg7: memref<288x256xf32, #tpu.memory_space<vmem>>) attributes {dimension_semantics = [#tpu.dimension_semantics<parallel>], iteration_bounds = array<i64: 2>, scalar_prefetch = 0 : i64, scratch_operands = 1 : i64, tpu.core_type = #tpu.core_type<tc>, window_params = [{transform_indices = @transform_0, window_bounds = array<i64: 1, 16, 256>}, {transform_indices = @transform_1, window_bounds = array<i64: 1, 16, 256>}, {pipeline_mode = #tpu.pipeline_mode<synchronous>, transform_indices = @transform_2, window_bounds = array<i64: 16, 288>}, {pipeline_mode = #tpu.pipeline_mode<synchronous>, transform_indices = @transform_3, window_bounds = array<i64: 16, 1>}, {pipeline_mode = #tpu.pipeline_mode<synchronous>, transform_indices = @transform_4, window_bounds = array<i64: 9, 256>}, {transform_indices = @transform_5, window_bounds = array<i64: 1, 16, 256>}]} {
    %c0 = arith.constant 0 : index
    %c0_0 = arith.constant 0 : index
    %c0_1 = arith.constant 0 : index
    %0 = vector.load %arg1[%c0, %c0_0, %c0_1] : memref<1x16x256xf32, #tpu.memory_space<vmem>>, vector<1x16x256xf32>
    %1 = vector.shape_cast %0 : vector<1x16x256xf32> to vector<16x256xf32>
    %c0_2 = arith.constant 0 : index
    %c0_3 = arith.constant 0 : index
    %c0_4 = arith.constant 0 : index
    %2 = vector.load %arg2[%c0_2, %c0_3, %c0_4] : memref<1x16x256xf32, #tpu.memory_space<vmem>>, vector<1x16x256xf32>
    %3 = vector.shape_cast %2 : vector<1x16x256xf32> to vector<16x256xf32>
    %4 = tpu.concatenate %1, %3 in 0 : vector<16x256xf32>, vector<16x256xf32> -> vector<32x256xf32>
    %c17_i32 = arith.constant 17 : i32
    %5 = tpu.dynamic_rotate %4 by %c17_i32 dim 1 : vector<32x256xf32>, i32 -> vector<32x256xf32>
    %c0_5 = arith.constant 0 : index
    %c0_6 = arith.constant 0 : index
    %6 = vector.load %arg5[%c0_5, %c0_6] : memref<9x256xf32, #tpu.memory_space<vmem>>, vector<1x256xf32>
    %7 = vector.broadcast %6 : vector<1x256xf32> to vector<32x256xf32>
    %8 = arith.mulf %5, %7 : vector<32x256xf32>
    %c0_7 = arith.constant 0 : index
    %c0_8 = arith.constant 0 : index
    %9 = vector.load %arg7[%c0_7, %c0_8] : memref<288x256xf32, #tpu.memory_space<vmem>>, vector<32x256xf32>
    tpu.vector_store %arg7[%c0_7, %c0_8], %8 {strides = array<i32>} : memref<288x256xf32, #tpu.memory_space<vmem>>, vector<32x256xf32>,
    %c16_i32 = arith.constant 16 : i32
    %10 = tpu.dynamic_rotate %4 by %c16_i32 dim 1 : vector<32x256xf32>, i32 -> vector<32x256xf32>
    %c1 = arith.constant 1 : index
    %c0_9 = arith.constant 0 : index
    %11 = vector.load %arg5[%c1, %c0_9] : memref<9x256xf32, #tpu.memory_space<vmem>>, vector<1x256xf32>
    %12 = vector.broadcast %11 : vector<1x256xf32> to vector<32x256xf32>
    %13 = arith.mulf %10, %12 : vector<32x256xf32>
    %c32 = arith.constant 32 : index
    %c0_10 = arith.constant 0 : index
    %14 = vector.load %arg7[%c32, %c0_10] : memref<288x256xf32, #tpu.memory_space<vmem>>, vector<32x256xf32>
    tpu.vector_store %arg7[%c32, %c0_10], %13 {strides = array<i32>} : memref<288x256xf32, #tpu.memory_space<vmem>>, vector<32x256xf32>,
    %c15_i32 = arith.constant 15 : i32
    %15 = tpu.dynamic_rotate %4 by %c15_i32 dim 1 : vector<32x256xf32>, i32 -> vector<32x256xf32>
    %c2 = arith.constant 2 : index
    %c0_11 = arith.constant 0 : index
    %16 = vector.load %arg5[%c2, %c0_11] : memref<9x256xf32, #tpu.memory_space<vmem>>, vector<1x256xf32>
    %17 = vector.broadcast %16 : vector<1x256xf32> to vector<32x256xf32>
    %18 = arith.mulf %15, %17 : vector<32x256xf32>
    %c64 = arith.constant 64 : index
    %c0_12 = arith.constant 0 : index
    %19 = vector.load %arg7[%c64, %c0_12] : memref<288x256xf32, #tpu.memory_space<vmem>>, vector<32x256xf32>
    tpu.vector_store %arg7[%c64, %c0_12], %18 {strides = array<i32>} : memref<288x256xf32, #tpu.memory_space<vmem>>, vector<32x256xf32>,
    %c1_i32 = arith.constant 1 : i32
    %20 = tpu.dynamic_rotate %4 by %c1_i32 dim 1 : vector<32x256xf32>, i32 -> vector<32x256xf32>
    %c3 = arith.constant 3 : index
    %c0_13 = arith.constant 0 : index
    %21 = vector.load %arg5[%c3, %c0_13] : memref<9x256xf32, #tpu.memory_space<vmem>>, vector<1x256xf32>
    %22 = vector.broadcast %21 : vector<1x256xf32> to vector<32x256xf32>
    %23 = arith.mulf %20, %22 : vector<32x256xf32>
    %c96 = arith.constant 96 : index
    %c0_14 = arith.constant 0 : index
    %24 = vector.load %arg7[%c96, %c0_14] : memref<288x256xf32, #tpu.memory_space<vmem>>, vector<32x256xf32>
    tpu.vector_store %arg7[%c96, %c0_14], %23 {strides = array<i32>} : memref<288x256xf32, #tpu.memory_space<vmem>>, vector<32x256xf32>,
    %c128 = arith.constant 128 : index
    %c0_15 = arith.constant 0 : index
    %25 = vector.load %arg7[%c128, %c0_15] : memref<288x256xf32, #tpu.memory_space<vmem>>, vector<32x256xf32>
    tpu.vector_store %arg7[%c128, %c0_15], %4 {strides = array<i32>} : memref<288x256xf32, #tpu.memory_space<vmem>>, vector<32x256xf32>,
    %c255_i32 = arith.constant 255 : i32
    %26 = tpu.dynamic_rotate %4 by %c255_i32 dim 1 : vector<32x256xf32>, i32 -> vector<32x256xf32>
    %c5 = arith.constant 5 : index
    %c0_16 = arith.constant 0 : index
    %27 = vector.load %arg5[%c5, %c0_16] : memref<9x256xf32, #tpu.memory_space<vmem>>, vector<1x256xf32>
    %28 = vector.broadcast %27 : vector<1x256xf32> to vector<32x256xf32>
    %29 = arith.mulf %26, %28 : vector<32x256xf32>
    %c160 = arith.constant 160 : index
    %c0_17 = arith.constant 0 : index
    %30 = vector.load %arg7[%c160, %c0_17] : memref<288x256xf32, #tpu.memory_space<vmem>>, vector<32x256xf32>
    tpu.vector_store %arg7[%c160, %c0_17], %29 {strides = array<i32>} : memref<288x256xf32, #tpu.memory_space<vmem>>, vector<32x256xf32>,
    %c241_i32 = arith.constant 241 : i32
    %31 = tpu.dynamic_rotate %4 by %c241_i32 dim 1 : vector<32x256xf32>, i32 -> vector<32x256xf32>
    %c6 = arith.constant 6 : index
    %c0_18 = arith.constant 0 : index
    %32 = vector.load %arg5[%c6, %c0_18] : memref<9x256xf32, #tpu.memory_space<vmem>>, vector<1x256xf32>
    %33 = vector.broadcast %32 : vector<1x256xf32> to vector<32x256xf32>
    %34 = arith.mulf %31, %33 : vector<32x256xf32>
    %c192 = arith.constant 192 : index
    %c0_19 = arith.constant 0 : index
    %35 = vector.load %arg7[%c192, %c0_19] : memref<288x256xf32, #tpu.memory_space<vmem>>, vector<32x256xf32>
    tpu.vector_store %arg7[%c192, %c0_19], %34 {strides = array<i32>} : memref<288x256xf32, #tpu.memory_space<vmem>>, vector<32x256xf32>,
    %c240_i32 = arith.constant 240 : i32
    %36 = tpu.dynamic_rotate %4 by %c240_i32 dim 1 : vector<32x256xf32>, i32 -> vector<32x256xf32>
    %c7 = arith.constant 7 : index
    %c0_20 = arith.constant 0 : index
    %37 = vector.load %arg5[%c7, %c0_20] : memref<9x256xf32, #tpu.memory_space<vmem>>, vector<1x256xf32>
    %38 = vector.broadcast %37 : vector<1x256xf32> to vector<32x256xf32>
    %39 = arith.mulf %36, %38 : vector<32x256xf32>
    %c224 = arith.constant 224 : index
    %c0_21 = arith.constant 0 : index
    %40 = vector.load %arg7[%c224, %c0_21] : memref<288x256xf32, #tpu.memory_space<vmem>>, vector<32x256xf32>
    tpu.vector_store %arg7[%c224, %c0_21], %39 {strides = array<i32>} : memref<288x256xf32, #tpu.memory_space<vmem>>, vector<32x256xf32>,
    %c239_i32 = arith.constant 239 : i32
    %41 = tpu.dynamic_rotate %4 by %c239_i32 dim 1 : vector<32x256xf32>, i32 -> vector<32x256xf32>
    %c8 = arith.constant 8 : index
    %c0_22 = arith.constant 0 : index
    %42 = vector.load %arg5[%c8, %c0_22] : memref<9x256xf32, #tpu.memory_space<vmem>>, vector<1x256xf32>
    %43 = vector.broadcast %42 : vector<1x256xf32> to vector<32x256xf32>
    %44 = arith.mulf %41, %43 : vector<32x256xf32>
    %c256 = arith.constant 256 : index
    %c0_23 = arith.constant 0 : index
    %45 = vector.load %arg7[%c256, %c0_23] : memref<288x256xf32, #tpu.memory_space<vmem>>, vector<32x256xf32>
    tpu.vector_store %arg7[%c256, %c0_23], %44 {strides = array<i32>} : memref<288x256xf32, #tpu.memory_space<vmem>>, vector<32x256xf32>,
    %c0_24 = arith.constant 0 : index
    %c0_25 = arith.constant 0 : index
    %46 = vector.load %arg3[%c0_24, %c0_25] : memref<16x288xf32, #tpu.memory_space<vmem>>, vector<16x288xf32>
    %c0_26 = arith.constant 0 : index
    %c0_27 = arith.constant 0 : index
    %47 = vector.load %arg7[%c0_26, %c0_27] : memref<288x256xf32, #tpu.memory_space<vmem>>, vector<288x256xf32>
    %cst = arith.constant dense<0.000000e+00> : vector<16x256xf32>
    %48 = tpu.matmul %46, %47, %cst {dimension_numbers = #tpu.dot_dimension_numbers<[1], [0], [0], [1], [0, 0, 1, 1], [], []>} : vector<16x288xf32>, vector<288x256xf32>, vector<16x256xf32> -> vector<16x256xf32>
    %c0_28 = arith.constant 0 : index
    %c0_29 = arith.constant 0 : index
    %49 = vector.load %arg4[%c0_28, %c0_29] : memref<16x1xf32, #tpu.memory_space<vmem>>, vector<16x1xf32>
    %50 = vector.broadcast %49 : vector<16x1xf32> to vector<16x256xf32>
    %51 = arith.addf %48, %50 : vector<16x256xf32>
    %cst_30 = arith.constant 0.000000e+00 : f32
    %52 = vector.broadcast %cst_30 : f32 to vector<16x256xf32>
    %53 = arith.maximumf %51, %52 : vector<16x256xf32>
    %c0_31 = arith.constant 0 : index
    %c0_32 = arith.constant 0 : index
    %c0_33 = arith.constant 0 : index
    %54 = vector.load %arg6[%c0_31, %c0_32, %c0_33] : memref<1x16x256xf32, #tpu.memory_space<vmem>>, vector<1x16x256xf32>
    %55 = vector.shape_cast %54 : vector<1x16x256xf32> to vector<16x256xf32>
    %56 = vector.shape_cast %53 : vector<16x256xf32> to vector<1x16x256xf32>
    tpu.vector_store %arg6[%c0_31, %c0_32, %c0_33], %56 {strides = array<i32>} : memref<1x16x256xf32, #tpu.memory_space<vmem>>, vector<1x16x256xf32>,
    return
  }
  func.func @transform_0(%arg0: i32) -> (i32, i32, i32) {
    %c0_i32 = arith.constant 0 : i32
    %c0_i32_0 = arith.constant 0 : i32
    %c0_i32_1 = arith.constant 0 : i32
    return %arg0, %c0_i32, %c0_i32_0 : i32, i32, i32
  }
  func.func @transform_1(%arg0: i32) -> (i32, i32, i32) {
    %c0_i32 = arith.constant 0 : i32
    %c0_i32_0 = arith.constant 0 : i32
    %c0_i32_1 = arith.constant 0 : i32
    return %arg0, %c0_i32, %c0_i32_0 : i32, i32, i32
  }
  func.func @transform_2(%arg0: i32) -> (i32, i32) {
    %c0_i32 = arith.constant 0 : i32
    %c0_i32_0 = arith.constant 0 : i32
    %c0_i32_1 = arith.constant 0 : i32
    return %c0_i32, %c0_i32_0 : i32, i32
  }
  func.func @transform_3(%arg0: i32) -> (i32, i32) {
    %c0_i32 = arith.constant 0 : i32
    %c0_i32_0 = arith.constant 0 : i32
    %c0_i32_1 = arith.constant 0 : i32
    return %c0_i32, %c0_i32_0 : i32, i32
  }
  func.func @transform_4(%arg0: i32) -> (i32, i32) {
    %c0_i32 = arith.constant 0 : i32
    %c0_i32_0 = arith.constant 0 : i32
    %c0_i32_1 = arith.constant 0 : i32
    return %c0_i32, %c0_i32_0 : i32, i32
  }
  func.func @transform_5(%arg0: i32) -> (i32, i32, i32) {
    %c0_i32 = arith.constant 0 : i32
    %c0_i32_0 = arith.constant 0 : i32
    %c0_i32_1 = arith.constant 0 : i32
    return %arg0, %c0_i32, %c0_i32_0 : i32, i32, i32
  }
}

</mosaic_0001>

<bundles_post_ra>
// kernel: tpu_custom_call.1
= control target key start
LH: loop header
LB: loop body
LE: loop exit
PB: predicated region body
PF: predicated region fallthrough
CT: control target
= control target key end

     0   :  { %s2022_s0 = inlined_call_operand.hbm [shape: f32[2,16,256], index: 0, kind: input, shape index: {}]   ;;  %s2023_s1 = inlined_call_operand.hbm [shape: f32[2,16,256], index: 1, kind: input, shape index: {}]   ;;  %s2024_s2 = inlined_call_operand.hbm [shape: f32[16,288], index: 2, kind: input, shape index: {}]   ;;  %s2025_s3 = inlined_call_operand.vmem [shape: f32[16,1], index: 3, kind: input, shape index: {}]   ;;  %s2026_s4 = inlined_call_operand.hbm [shape: f32[9,256], index: 4, kind: input, shape index: {}]   ;;  %s2027_s5 = inlined_call_operand.hbm [shape: f32[2,16,256], index: 5, kind: output, shape index: {}]  }
   0x1   :  { %2035 = sst [smem:[#allocation17_spill]] %s2022_s0 }
   0x2   :  { %2036 = sst [smem:[#allocation18_spill]] %s2024_s2 }
   0x3   :  { %10 = vsyncpa [#allocation4], 0 }
   0x4   :  { %12 = vsyncpa [#allocation4 + $0x1], 0 }
   0x5   :  { %13 = vsyncpa [#allocation7], 0 }
   0x6   :  { %15 = vsyncpa [#allocation7 + $0x1], 0 }
   0x7   :  { %16 = vsyncpa [#allocation10], 0 }
   0x8   :  { %17 = vsyncpa [#allocation5], 0 }
   0x9   :  { %19 = vsyncpa [#allocation5 + $0x1], 0  ;;  %s1501_s18 = smov 0   ;;  %s1503_s19 = smov 0  }
   0xa   :  { %s1505_s20 = smov 0   ;;  %s1507_s21 = smov 0  }
   0xb LB: > { %s1522_s22 = sadd.s32 4294967295, %s1449_s21   ;;  %s1149_s23 = sadd.s32 4294967294, %s1449_s21   ;;  %s1449_s21 = sphi %s1507_s21, %s2059_s21   ;;  %s1445_s20 = sphi %s1505_s20, %s2058_s20   ;;  %s1441_s19 = sphi %s1503_s19, %s2057_s19   ;;  %s1437_s18 = sphi %s1501_s18, %s2056_s18  }
   0xc   : > { %p45_p0 = scmp.ne.s32.totalorder %s1441_s19, %s1437_s18  ;;  %p2028_p1 = scmp.eq.s32.totalorder %s1522_s22, 0 }
   0xd   : > { %p164_p3 = scmp.eq.s32.totalorder %s1149_s23, 1  ;;  %p1150_p5 = scmp.ge.s32.totalorder %s1449_s21, 1 }
   0xe   : > { %p1531_p4 = por %p2028_p1, %p45_p0  ;;  %p171_p7 = scmp.lt.s32.totalorder %s1449_s21, 3 }
   0xf   : > { %p1536_p6 = por %p164_p3, %p45_p0  ;;  %s1451_s27 = smov [#allocation8]  }
  0x10   : > { %s2037_s24 = scalar_select %p1531_p4, 1, 0 }
  0x11   : > { %s2038_s25 = scalar_select %p1536_p6, 1, 0 }
  0x12   : > { %p1541_p8 = pnand %p1150_p5, %p171_p7  ;;  %s183_s28 = sshll.u32 %s1451_s27, 4  ;;  %s184_s28 = int_to_ptr.vmem [resolvable:$true] %s183_s28 }
  0x13   : > { %s1452_s30 = smov [#allocation9]   ;;  %s1276_s7 = scalar_lea.vmem %s184_s28, 768 }
  0x14   : > { %p1190_p9 = pneg %p1541_p8  ;;  %s199_s6 = sshll.u32 %s1452_s30, 4  ;;  %s200_s6 = int_to_ptr.vmem [resolvable:$true] %s199_s6 }
  0x15   : > { %p1277_p13 = scmp.ne.s32.totalorder %s184_s28, %s1276_s7  ;;  %p1284_p5 = scmp.lt.s32.totalorder %s184_s28, %s184_s28 }
  0x16   : > { %p1550_p11 = pnand %p1190_p9, %p2028_p1  ;;  %p1285_p7 = scmp.lt.s32.totalorder %s1276_s7, %s1276_s7 }
  0x18   : > { %p1267_p12 = pneg %p1550_p11  ;;  %p1286_p10 = por %p1285_p7, %p1284_p5 }
  0x1a   : > { %p1279_p0 = pnand %p1277_p13, %p1267_p12 }
  0x1c   : > { %p1280_p3 = pneg %p1279_p0 }
  0x1e   : > { %p1287_p9 = pnand %p1286_p10, %p1280_p3 }
  0x20   : > { %1290 = shalt.err (!%p1287_p9)
}
  0x21   : > { %s1453_s8 = smov 384   ;;  %s1454_s9 = smov 24  }
  0x22   : > { %s2041_s2 = sld [smem:[#allocation18_spill]]  ;;  %s1302_s12 = scalar_lea.vmem %s200_s6, 512 }
  0x23   : > { %p1303_p1 = scmp.ne.s32.totalorder %s200_s6, %s1302_s12  ;;  %p1310_p2 = scmp.lt.s32.totalorder %s200_s6, %s200_s6 }
  0x24   : > { %p1311_p6 = scmp.lt.s32.totalorder %s1302_s12, %s1302_s12 }
  0x25   : > { %p1305_p13 = pnand %p1303_p1, %p1267_p12 }
  0x26   : > { %p1312_p5 = por %p1311_p6, %p1310_p2 }
  0x27   : > { %p1306_p0 = pneg %p1305_p13 }
  0x28   : > { %1193 = dma.hbm_to_vmem [thread:$0]  (!%p1550_p11), %s2041_s2, 768, %s184_s28, [#allocation7], %s1453_s8, %s1453_s8, %s1454_s9  }
  0x29   : > { %p1313_p10 = pnand %p1312_p5, %p1306_p0 }
  0x2b   : > { %1316 = shalt.err (!%p1313_p10)
}
  0x2c   : > { %s2029_s13 = smov 256   ;;  %s2031_s14 = smov 16  }
  0x2d   : > { %1196 = dma.hbm_to_vmem [thread:$0]  (!%p1550_p11), %s2026_s4, 512, %s200_s6, [#allocation10], %s2029_s13, %s2029_s13, %s2031_s14  }
  0x2e   : > { %s1576_s17 = sadd.s32 1, %s1449_s21   ;;  %s32_s27 = sadd.s32 1, %s1445_s20 }
  0x2f   : > { %s29_s23 = ssub.s32 %s1449_s21, %s1576_s17  ;;  %p39_p2 = scmp.ne.s32.totalorder %s1445_s20, %s1441_s19 }
  0x30   : > { %p30_p1 = scmp.eq.s32.totalorder %s29_s23, 0  ;;  %p40_p6 = scmp.eq.s32.totalorder %s1449_s21, 0 }
  0x31   : > { %p2042_p3 = scmp.eq.s32.totalorder %s1522_s22, 1  ;;  %p1210_p9 = scmp.lt.s32.totalorder %s1449_s21, 2 }
  0x32   : > { %s1585_s28 = scalar_select %p30_p1, %s1445_s20, %s32_s27  }
  0x33   : > { %p41_p12 = por %p40_p6, %p39_p2  ;;  %p1589_p7 = por %p2042_p3, %p39_p2 }
  0x34   : > { %s213_s30 = sand.u32 1, %s1445_s20   ;;  %s1173_s6 = sshll.u32 %s1449_s21, 9 }
  0x35   : > { %s2043_s29 = scalar_select %p1589_p7, 1, 0 }
  0x36   : > { %s1154_s7 = sshll.u32 %s213_s30, 5  ;;  %s2044_s0 = sld [smem:[#allocation17_spill]] }
  0x37   : > { %s217_s11 = scalar_lea.vmem [#allocation3], %s1154_s7  ;;  %p1603_p11 = pnand %p1210_p9, %p41_p12 }
  0x38   : > { %s224_s12 = sshll.u32 %s217_s11, 4  ;;  %s1610_s27 = scalar_lea.hbm %s2023_s1, %s1173_s6  ;;  %s1601_s12 = int_to_ptr.vmem [resolvable:$true] %s224_s12 }
  0x39   : > { %s238_s8 = scalar_lea.vmem [#allocation6], %s1154_s7  ;;  %s1614_s13 = scalar_lea.sflag [#allocation4], %s213_s30 }
  0x3a   : > { %s1612_s9 = sshll.u32 %s238_s8, 4  ;;  %p1319_p0 = pneg %p1603_p11  ;;  %s1645_s9 = int_to_ptr.vmem [resolvable:$true] %s1612_s9 }
  0x3c   : > { %s1599_s10 = scalar_lea.hbm %s2044_s0, %s1173_s6  ;;  %s1322_s16 = scalar_lea.hbm %s2044_s0, 1024 }
  0x3d   : > { %s1317_s14 = scalar_lea.hbm %s1599_s10, 512  ;;  %p1323_p1 = scmp.lt.s32.totalorder %s1599_s10, %s2044_s0 }
  0x3e   : > { %p1318_p13 = scmp.ne.s32.totalorder %s1599_s10, %s1317_s14  ;;  %p1324_p2 = scmp.lt.s32.totalorder %s1322_s16, %s1317_s14 }
  0x40   : > { %p1320_p5 = pnand %p1319_p0, %p1318_p13  ;;  %p1325_p6 = por %p1324_p2, %p1323_p1 }
  0x42   : > { %p1321_p10 = pneg %p1320_p5 }
  0x44   : > { %p1326_p12 = pnand %p1325_p6, %p1321_p10 }
  0x46   : > { %1329 = shalt.err (!%p1326_p12)
}
  0x47   : > { %s1330_s30 = scalar_lea.vmem %s1601_s12, 512  ;;  %s1457_s2 = smov [#allocation3]  }
  0x48   : > { %p1331_p3 = scmp.ne.s32.totalorder %s1601_s12, %s1330_s30  ;;  %s1335_s7 = sshll.u32 %s1457_s2, 4  ;;  %s1336_s7 = int_to_ptr.vmem [resolvable:$false] %s1335_s7 }
  0x49   : > { %s1337_s8 = scalar_lea.vmem %s1336_s7, 1024  ;;  %p1338_p5 = scmp.lt.s32.totalorder %s1601_s12, %s1336_s7 }
  0x4a   : > { %p1333_p9 = pnand %p1331_p3, %p1319_p0  ;;  %p1339_p7 = scmp.lt.s32.totalorder %s1337_s8, %s1330_s30 }
  0x4c   : > { %p1334_p13 = pneg %p1333_p9  ;;  %p1340_p4 = por %p1339_p7, %p1338_p5 }
  0x4e   : > { %p1341_p1 = pnand %p1340_p4, %p1334_p13 }
  0x50   : > { %1344 = shalt.err (!%p1341_p1)
}
  0x51   : > { %s2046_s14 = smov 16   ;;  %s2047_s11 = smov 256  }
  0x52   : > { %1200 = dma.hbm_to_vmem [thread:$0]  (!%p1603_p11), %s1599_s10, 512, %s1601_s12, %s1614_s13, %s2047_s11, %s2047_s11, %s2046_s14  }
  0x53   : > { %s234_s16 = sand.u32 1, %s1449_s21   ;;  %s1345_s6 = scalar_lea.hbm %s1610_s27, 512 }
  0x54   : > { %s235_s23 = scalar_lea.sflag [#allocation7], %s234_s16  ;;  %p1346_p4 = scmp.ne.s32.totalorder %s1610_s27, %s1345_s6 }
  0x55   : > { %s1350_s7 = scalar_lea.hbm %s2023_s1, 1024  ;;  %p1351_p2 = scmp.lt.s32.totalorder %s1610_s27, %s2023_s1 }
  0x56   : > { %p1348_p7 = pnand %p1346_p4, %p1319_p0  ;;  %p1352_p6 = scmp.lt.s32.totalorder %s1350_s7, %s1345_s6 }
  0x58   : > { %p1349_p10 = pneg %p1348_p7  ;;  %p1353_p12 = por %p1352_p6, %p1351_p2 }
  0x5a   : > { %p1354_p3 = pnand %p1353_p12, %p1349_p10 }
  0x5c   : > { %1357 = shalt.err (!%p1354_p3)
}
  0x5d   : > { %s1358_s13 = scalar_lea.vmem %s1645_s9, 512  ;;  %s1458_s10 = smov [#allocation6]  }
  0x5e   : > { %p1359_p9 = scmp.ne.s32.totalorder %s1645_s9, %s1358_s13  ;;  %s1363_s12 = sshll.u32 %s1458_s10, 4  ;;  %s1364_s12 = int_to_ptr.vmem [resolvable:$false] %s1363_s12 }
  0x5f   : > { %s1365_s16 = scalar_lea.vmem %s1364_s12, 1024  ;;  %p1366_p1 = scmp.lt.s32.totalorder %s1645_s9, %s1364_s12 }
  0x60   : > { %p1361_p13 = pnand %p1359_p9, %p1319_p0  ;;  %p1367_p4 = scmp.lt.s32.totalorder %s1365_s16, %s1358_s13 }
  0x62   : > { %p1362_p5 = pneg %p1361_p13  ;;  %p1368_p7 = por %p1367_p4, %p1366_p1 }
  0x64   : > { %p1369_p2 = pnand %p1368_p7, %p1362_p5 }
  0x66   : > { %1372 = shalt.err (!%p1369_p2)
}
  0x67   : > { %1203 = dma.hbm_to_vmem [thread:$0]  (!%p1603_p11), %s1610_s27, 512, %s1645_s9, %s235_s23, %s2047_s11, %s2047_s11, %s2046_s14  }
  0x68   : > { %257 = sbr.rel (%p1541_p8) target bundleno = 582 (0x246), region = 40  ;;  %s1676_s0 = sand.u32 (!%p1541_p8), 1, %s1441_s19  }
  0x69   : > { %s1679_s6 = sshll.u32 (!%p1541_p8), %s1676_s0, 5  ;;  %s260_s30 = scalar_lea.sflag (!%p1541_p8), [#allocation4], %s1676_s0 }
  0x6a   : > { %s263_s15 = scalar_lea.vmem (!%p1541_p8), [#allocation3], %s1679_s6  ;;  %p2048_p0 = scmp.ne.s32.totalorder (!%p1541_p8), %s2037_s24, 0 }
  0x6d   : > { %1416 = dma.done.wait (%p2048_p0), %s260_s30, 512  }
  0x6e   : > { %1418 = vsyncadd (%p2048_p0), %s260_s30, 4294966784  ;;  %s268_s26 = sand.u32 1, %s1522_s22   ;;  %s272_s9 = scalar_lea.vmem [#allocation6], %s1679_s6 }
  0x6f   : > { %s269_s27 = scalar_lea.sflag [#allocation7], %s268_s26 }
  0x70   : > { %1420 = dma.done.wait (%p2048_p0), %s269_s27, 512  }
  0x71   : > { %1422 = vsyncadd (%p2048_p0), %s269_s27, 4294966784  ;;  %p2049_p8 = scmp.eq.s32.totalorder %s1522_s22, 0 }
  0x73   : > { %1424 = dma.done.wait (%p2049_p8), [#allocation7], 768   ;;  %p2050_p11 = pmov %p2049_p8 }
  0x74   : > { %p2051_p10 = pmov %p2049_p8 }
  0x75   : > { %1426 = vsyncadd (%p2050_p11), [#allocation7], 4294966528 }
  0x76   : > { %1428 = dma.done.wait (%p2051_p10), [#allocation10], 512   ;;  %p2052_p6 = pmov %p2049_p8 }
  0x77   : > { %v1701_v0 = vld [vmem:[%s272_s9 + $0x10] sm:$0xff]  ;;  %v1703_v1 = vld [vmem:[%s272_s9] sm:$0xff]  ;;  %s1459_s14 = smov 1   ;;  %v1707_v2 = vld [vmem:[%s272_s9 + $0x18] sm:$0xff]  ;;  %s1460_s24 = smov 15   ;;  %v336_v8 = vlaneseq  ;;  %v1467_v19 = vmov 0.0  }
  0x78   : > { %1430 = vsyncadd (%p2052_p6), [#allocation10], 4294966784  ;;  %489 = vrot.lane.b32.xlu0 %v1701_v0, %s1459_s14  ;;  %487 = vrot.lane.b32.xlu1 %v1703_v1, %s1459_s14  ;;  %v1709_v3 = vld [vmem:[%s272_s9 + $0x8] sm:$0xff]  ;;  %v1713_v4 = vld [vmem:[%s263_s15 + $0x18] sm:$0xff]  ;;  %s1461_s11 = smov 16   ;;  %s1462_s23 = smov 17  }
  0x79   : > { %v1715_v5 = vld [vmem:[%s263_s15 + $0x10] sm:$0xff]  ;;  %v1719_v6 = vld [vmem:[%s263_s15 + $0x8] sm:$0xff]  ;;  %v1721_v7 = vld [vmem:[%s263_s15] sm:$0xff]  ;;  %s1463_s2 = smov 112   ;;  %s1464_s7 = smov 113   ;;  %v350_v9 = vshrl.u32 %v336_v8, 7  ;;  %999 = vmatprep.mubr.f32.mxu1 %v1467_v19 }
  0x7a   : > { %s1465_s8 = smov 127   ;;  %v762_v10 = vld [vmem:[#allocation8 + $0x8] sm:$0xff]  ;;  %s1466_s13 = smov 111   ;;  %v1785_v11 = vand.u32 127, %v336_v8  ;;  %v1468_v31 = vmov 0   ;;  %v839_v41 = vld [vmem:[%s2025_s3] sm:$0xff] }
  0x7b   : > { %v1787_v12 = vsub.s32 1, %v350_v9  ;;  %v1789_v13 = vsub.s32 0, %v350_v9  ;;  %v509_v14 = vld [vmem:[#allocation9 + $0x3] ss:$8 sm:$0x3]  ;;  %922 = vmatprep.mubr.f32.mxu0 %v762_v10  ;;  %1263 = vset.pattern.permute.xlu0 %v1468_v31  ;;  %v840_v38 = vld [vmem:[%s2025_s3 + $0x8] sm:$0xff] }
  0x7c   : > { %497 = vrot.lane.b32.xlu0 %v1707_v2, %s1459_s14  ;;  %495 = vrot.lane.b32.xlu1 %v1709_v3, %s1459_s14  ;;  %vm499_vm0 = vcmp.lt.s32.totalorder %v1785_v11, 1  ;;  %v455_v37 = vld [vmem:[#allocation9 + $0x2] ss:$8 sm:$0x3]  ;;  %vm445_vm1 = vcmp.lt.s32.totalorder %v1785_v11, 15  ;;  %vm391_vm2 = vcmp.lt.s32.totalorder %v1785_v11, 16 }
  0x7d   : > { %v518_v17 = vrot.slane %v509_v14, %v1787_v12  ;;  %v514_v18 = vrot.slane %v509_v14, %v1789_v13  ;;  %1264 = vset.pattern.permute.xlu1 %v1468_v31  ;;  %v460_v46 = vrot.slane %v455_v37, %v1789_v13  ;;  %v464_v47 = vrot.slane %v455_v37, %v1787_v12  ;;  %v401_v10 = vld [vmem:[#allocation9 + $0x1] ss:$8 sm:$0x3]  ;;  %s311_s15 = scalar_lea.vmem [#allocation11], %s1679_s6  ;;  %s1175_s27 = sshll.u32 %s1522_s22, 9 }
  0x7e   : > { %vm338_vm3 = vcmp.lt.s32.totalorder %v1785_v11, 17  ;;  %vm669_vm4 = vcmp.lt.s32.totalorder %v1785_v11, 112  ;;  %vm615_vm5 = vcmp.lt.s32.totalorder %v1785_v11, 113  ;;  %vm561_vm6 = vcmp.lt.s32.totalorder %v1785_v11, 127  ;;  %s1034_s26 = sshll.u32 %s311_s15, 4  ;;  %p2053_p3 = scmp.ne.s32.totalorder %s2043_s29, 0  ;;  %s1973_s26 = int_to_ptr.vmem [resolvable:$true] %s1034_s26 }
  0x7f   : > { %vm723_vm7 = vcmp.lt.s32.totalorder %v1785_v11, 111  ;;  %vm851_vm8 = vcmask 261120   ;;  %s1469_s22 = smov [#allocation11]  }
  0x80   : > { %493 = vrot.lane.b32.xlu1 %v1713_v4, %s1459_s14  ;;  %485 = vrot.lane.b32.xlu0 %v1715_v5, %s1459_s14 }
  0x84   : > { %491 = vrot.lane.b32.xlu1 %v1719_v6, %s1459_s14  ;;  %483 = vrot.lane.b32.xlu0 %v1721_v7, %s1459_s14  ;;  %s1978_s14 = scalar_lea.hbm %s2027_s5, %s1175_s27 }
  0x88   : > { %443 = vrot.lane.b32.xlu1 %v1707_v2, %s1460_s24  ;;  %435 = vrot.lane.b32.xlu0 %v1701_v0, %s1460_s24 }
  0x8c   : > { %441 = vrot.lane.b32.xlu1 %v1709_v3, %s1460_s24  ;;  %433 = vrot.lane.b32.xlu0 %v1703_v1, %s1460_s24 }
  0x90   : > { %439 = vrot.lane.b32.xlu1 %v1713_v4, %s1460_s24  ;;  %431 = vrot.lane.b32.xlu0 %v1715_v5, %s1460_s24 }
  0x94   : > { %437 = vrot.lane.b32.xlu1 %v1719_v6, %s1460_s24  ;;  %429 = vrot.lane.b32.xlu0 %v1721_v7, %s1460_s24  ;;  %s1021_s24 = scalar_lea.sflag [#allocation5], %s1676_s0 }
  0x98   : > { %389 = vrot.lane.b32.xlu1 %v1707_v2, %s1461_s11  ;;  %381 = vrot.lane.b32.xlu0 %v1701_v0, %s1461_s11 }
  0x9c   : > { %387 = vrot.lane.b32.xlu1 %v1709_v3, %s1461_s11  ;;  %379 = vrot.lane.b32.xlu0 %v1703_v1, %s1461_s11 }
  0xa0   : > { %385 = vrot.lane.b32.xlu1 %v1713_v4, %s1461_s11  ;;  %377 = vrot.lane.b32.xlu0 %v1715_v5, %s1461_s11 }
  0xa4   : > { %383 = vrot.lane.b32.xlu1 %v1719_v6, %s1461_s11  ;;  %375 = vrot.lane.b32.xlu0 %v1721_v7, %s1461_s11 }
  0xa8   : > { %334 = vrot.lane.b32.xlu1 %v1707_v2, %s1462_s23  ;;  %326 = vrot.lane.b32.xlu0 %v1701_v0, %s1462_s23 }
  0xac   : > { %332 = vrot.lane.b32.xlu1 %v1709_v3, %s1462_s23  ;;  %324 = vrot.lane.b32.xlu0 %v1703_v1, %s1462_s23 }
  0xb0   : > { %330 = vrot.lane.b32.xlu1 %v1713_v4, %s1462_s23  ;;  %322 = vrot.lane.b32.xlu0 %v1715_v5, %s1462_s23 }
  0xb4   : > { %328 = vrot.lane.b32.xlu1 %v1719_v6, %s1462_s23  ;;  %320 = vrot.lane.b32.xlu0 %v1721_v7, %s1462_s23  ;;  %s1373_s23 = scalar_lea.vmem %s1973_s26, 512 }
  0xb5   : > { %p1374_p12 = scmp.ne.s32.totalorder %s1973_s26, %s1373_s23 }
  0xb7   : > { %p1375_p9 = pnand %p1374_p12, %p2053_p3 }
  0xb8   : > { %667 = vrot.lane.b32.xlu1 %v1707_v2, %s1463_s2  ;;  %659 = vrot.lane.b32.xlu0 %v1701_v0, %s1463_s2 }
  0xb9   : > { %p1376_p13 = pneg %p1375_p9 }
  0xbc   : > { %665 = vrot.lane.b32.xlu1 %v1709_v3, %s1463_s2  ;;  %657 = vrot.lane.b32.xlu0 %v1703_v1, %s1463_s2 }
  0xc0   : > { %663 = vrot.lane.b32.xlu1 %v1713_v4, %s1463_s2  ;;  %655 = vrot.lane.b32.xlu0 %v1715_v5, %s1463_s2 }
  0xc4   : > { %661 = vrot.lane.b32.xlu1 %v1719_v6, %s1463_s2  ;;  %653 = vrot.lane.b32.xlu0 %v1721_v7, %s1463_s2  ;;  %s1377_s2 = sshll.u32 %s1469_s22, 4  ;;  %s1378_s2 = int_to_ptr.vmem [resolvable:$false] %s1377_s2 }
  0xc5   : > { %p1380_p5 = scmp.lt.s32.totalorder %s1973_s26, %s1378_s2 }
  0xc8   : > { %613 = vrot.lane.b32.xlu1 %v1707_v2, %s1464_s7  ;;  %605 = vrot.lane.b32.xlu0 %v1701_v0, %s1464_s7 }
  0xcc   : > { %611 = vrot.lane.b32.xlu1 %v1709_v3, %s1464_s7  ;;  %603 = vrot.lane.b32.xlu0 %v1703_v1, %s1464_s7 }
  0xd0   : > { %609 = vrot.lane.b32.xlu1 %v1713_v4, %s1464_s7  ;;  %601 = vrot.lane.b32.xlu0 %v1715_v5, %s1464_s7 }
  0xd4   : > { %607 = vrot.lane.b32.xlu1 %v1719_v6, %s1464_s7  ;;  %599 = vrot.lane.b32.xlu0 %v1721_v7, %s1464_s7  ;;  %s1379_s7 = scalar_lea.vmem %s1378_s2, 1024 }
  0xd5   : > { %p1381_p1 = scmp.lt.s32.totalorder %s1379_s7, %s1373_s23 }
  0xd7   : > { %p1382_p4 = por %p1381_p1, %p1380_p5 }
  0xd8   : > { %559 = vrot.lane.b32.xlu1 %v1707_v2, %s1465_s8  ;;  %551 = vrot.lane.b32.xlu0 %v1701_v0, %s1465_s8 }
  0xd9   : > { %p1383_p7 = pnand %p1382_p4, %p1376_p13 }
  0xdc   : > { %557 = vrot.lane.b32.xlu1 %v1709_v3, %s1465_s8  ;;  %549 = vrot.lane.b32.xlu0 %v1703_v1, %s1465_s8 }
  0xe0   : > { %555 = vrot.lane.b32.xlu1 %v1713_v4, %s1465_s8  ;;  %547 = vrot.lane.b32.xlu0 %v1715_v5, %s1465_s8 }
  0xe4   : > { %553 = vrot.lane.b32.xlu1 %v1719_v6, %s1465_s8  ;;  %545 = vrot.lane.b32.xlu0 %v1721_v7, %s1465_s8 }
  0xe8   : > { %721 = vrot.lane.b32.xlu1 %v1707_v2, %s1466_s13  ;;  %713 = vrot.lane.b32.xlu0 %v1701_v0, %s1466_s13 }
  0xea   : > { %v490_v15 = vpop.permute.xlu0 %489  ;;  %v488_v16 = vpop.permute.xlu1 %487 }
  0xec   : > { %719 = vrot.lane.b32.xlu1 %v1709_v3, %s1466_s13  ;;  %711 = vrot.lane.b32.xlu0 %v1703_v1, %s1466_s13 }
  0xee   : > { %v498_v20 = vpop.permute.xlu0 %497  ;;  %v496_v21 = vpop.permute.xlu1 %495 }
  0xef   : > { %v507_v22 = vsel %vm499_vm0, %v498_v20, %v490_v15  ;;  %v502_v23 = vsel %vm499_vm0, %v488_v16, %v496_v21  ;;  %v503_v24 = vsel %vm499_vm0, %v490_v15, %v498_v20  ;;  %v506_v25 = vsel %vm499_vm0, %v496_v21, %v488_v16 }
  0xf0   : > { %717 = vrot.lane.b32.xlu1 %v1713_v4, %s1466_s13  ;;  %709 = vrot.lane.b32.xlu0 %v1715_v5, %s1466_s13  ;;  %v528_v26 = vmul.f32 %v518_v17, %v503_v24  ;;  %v527_v27 = vmul.f32 %v514_v18, %v507_v22  ;;  %v526_v28 = vmul.f32 %v518_v17, %v502_v23 }
  0xf1   : > { %v525_v32 = vmul.f32 %v514_v18, %v506_v25  ;;  %v406_v21 = vrot.slane %v401_v10, %v1789_v13  ;;  %v410_v22 = vrot.slane %v401_v10, %v1787_v12 }
  0xf2   : > { %858 = vmatprep.subr.mxu0 %v528_v26  ;;  %v494_v29 = vpop.permute.xlu1 %493  ;;  %v486_v30 = vpop.permute.xlu0 %485 }
  0xf3   : > { %v501_v33 = vsel %vm499_vm0, %v486_v30, %v494_v29  ;;  %v505_v34 = vsel %vm499_vm0, %v494_v29, %v486_v30  ;;  %859 = vmatpush1.msra.mxu0 %v527_v27 }
  0xf4   : > { %v523_v35 = vmul.f32 %v514_v18, %v505_v34  ;;  %v524_v36 = vmul.f32 %v518_v17, %v501_v33  ;;  %860 = vmatprep.subr.mxu0 %v526_v28  ;;  %715 = vrot.lane.b32.xlu1 %v1719_v6, %s1466_s13 }
  0xf5   : > { %707 = vrot.lane.b32.xlu0 %v1721_v7, %s1466_s13  ;;  %861 = vmatpush1.msra.mxu0 %v525_v32 }
  0xf6   : > { %862 = vmatprep.subr.mxu0 %v524_v36  ;;  %v492_v39 = vpop.permute.xlu1 %491  ;;  %v484_v40 = vpop.permute.xlu0 %483 }
  0xf7   : > { %v500_v42 = vsel %vm499_vm0, %v484_v40, %v492_v39  ;;  %v504_v43 = vsel %vm499_vm0, %v492_v39, %v484_v40  ;;  %863 = vmatpush1.msra.mxu0 %v523_v35 }
  0xf8   : > { %v521_v44 = vmul.f32 %v514_v18, %v504_v43  ;;  %v522_v45 = vmul.f32 %v518_v17, %v500_v42  ;;  %848 = vperm.xlu1 %1264, %v840_v38  }
  0xf9   : > { %843 = vperm.xlu0 %1263, %v839_v41   ;;  %v347_v41 = vld [vmem:[#allocation9] ss:$8 sm:$0x3] }
  0xfa   : > { %v444_v48 = vpop.permute.xlu1 %443  ;;  %864 = vmatprep.subr.mxu0 %v522_v45  ;;  %v436_v49 = vpop.permute.xlu0 %435 }
  0xfb   : > { %v449_v50 = vsel %vm445_vm1, %v436_v49, %v444_v48  ;;  %v453_v51 = vsel %vm445_vm1, %v444_v48, %v436_v49  ;;  %865 = vmatpush1.msra.mxu0 %v521_v44  ;;  %v352_v48 = vrot.slane %v347_v41, %v1789_v13  ;;  %v356_v49 = vrot.slane %v347_v41, %v1787_v12 }
  0xfc   : > { %v473_v52 = vmul.f32 %v460_v46, %v453_v51  ;;  %v474_v53 = vmul.f32 %v464_v47, %v449_v50 }
  0xfe   : > { %v442_v54 = vpop.permute.xlu1 %441  ;;  %866 = vmatprep.subr.mxu0 %v474_v53  ;;  %v434_v55 = vpop.permute.xlu0 %433 }
  0xff   : > { %v448_v56 = vsel %vm445_vm1, %v434_v55, %v442_v54  ;;  %v452_v57 = vsel %vm445_vm1, %v442_v54, %v434_v55  ;;  %867 = vmatpush1.msra.mxu0 %v473_v52 }
 0x100   : > { %v471_v58 = vmul.f32 %v460_v46, %v452_v57  ;;  %v472_v59 = vmul.f32 %v464_v47, %v448_v56 }
 0x102   : > { %v440_v60 = vpop.permute.xlu1 %439  ;;  %868 = vmatprep.subr.mxu0 %v472_v59  ;;  %v432_v61 = vpop.permute.xlu0 %431 }
 0x103   : > { %v447_v62 = vsel %vm445_vm1, %v432_v61, %v440_v60  ;;  %v451_v63 = vsel %vm445_vm1, %v440_v60, %v432_v61  ;;  %869 = vmatpush1.msra.mxu0 %v471_v58 }
 0x104   : > { %v469_v8 = vmul.f32 %v460_v46, %v451_v63  ;;  %v470_v9 = vmul.f32 %v464_v47, %v447_v62 }
 0x106   : > { %v438_v14 = vpop.permute.xlu1 %437  ;;  %870 = vmatprep.subr.mxu0 %v470_v9  ;;  %v430_v15 = vpop.permute.xlu0 %429 }
 0x107   : > { %v446_v16 = vsel %vm445_vm1, %v430_v15, %v438_v14  ;;  %v450_v17 = vsel %vm445_vm1, %v438_v14, %v430_v15  ;;  %871 = vmatpush1.msra.mxu0 %v469_v8  ;;  %v679_v15 = vld [vmem:[#allocation9 + $0x7] ss:$8 sm:$0x3] }
 0x108   : > { %v467_v18 = vmul.f32 %v460_v46, %v450_v17  ;;  %v468_v20 = vmul.f32 %v464_v47, %v446_v16 }
 0x10a   : > { %v390_v23 = vpop.permute.xlu1 %389  ;;  %872 = vmatprep.subr.mxu0 %v468_v20  ;;  %v382_v24 = vpop.permute.xlu0 %381 }
 0x10b   : > { %v395_v25 = vsel %vm391_vm2, %v382_v24, %v390_v23  ;;  %v399_v26 = vsel %vm391_vm2, %v390_v23, %v382_v24  ;;  %873 = vmatpush1.msra.mxu0 %v467_v18  ;;  %v684_v23 = vrot.slane %v679_v15, %v1789_v13  ;;  %v688_v24 = vrot.slane %v679_v15, %v1787_v12 }
 0x10c   : > { %v419_v27 = vmul.f32 %v406_v21, %v399_v26  ;;  %v420_v28 = vmul.f32 %v410_v22, %v395_v25 }
 0x10e   : > { %v388_v29 = vpop.permute.xlu1 %387  ;;  %874 = vmatprep.subr.mxu0 %v420_v28  ;;  %v380_v30 = vpop.permute.xlu0 %379 }
 0x10f   : > { %v394_v31 = vsel %vm391_vm2, %v380_v30, %v388_v29  ;;  %v398_v32 = vsel %vm391_vm2, %v388_v29, %v380_v30  ;;  %875 = vmatpush1.msra.mxu0 %v419_v27 }
 0x110   : > { %v417_v33 = vmul.f32 %v406_v21, %v398_v32  ;;  %v418_v34 = vmul.f32 %v410_v22, %v394_v31 }
 0x112   : > { %v386_v35 = vpop.permute.xlu1 %385  ;;  %876 = vmatprep.subr.mxu0 %v418_v34  ;;  %v378_v36 = vpop.permute.xlu0 %377 }
 0x113   : > { %v393_v37 = vsel %vm391_vm2, %v378_v36, %v386_v35  ;;  %v397_v38 = vsel %vm391_vm2, %v386_v35, %v378_v36  ;;  %877 = vmatpush1.msra.mxu0 %v417_v33 }
 0x114   : > { %v415_v39 = vmul.f32 %v406_v21, %v397_v38  ;;  %v416_v40 = vmul.f32 %v410_v22, %v393_v37 }
 0x116   : > { %v384_v42 = vpop.permute.xlu1 %383  ;;  %878 = vmatprep.subr.mxu0 %v416_v40  ;;  %v376_v43 = vpop.permute.xlu0 %375 }
 0x117   : > { %v392_v44 = vsel %vm391_vm2, %v376_v43, %v384_v42  ;;  %v396_v45 = vsel %vm391_vm2, %v384_v42, %v376_v43  ;;  %879 = vmatpush1.msra.mxu0 %v415_v39  ;;  %v625_v43 = vld [vmem:[#allocation9 + $0x6] ss:$8 sm:$0x3] }
 0x118   : > { %v413_v46 = vmul.f32 %v406_v21, %v396_v45  ;;  %v414_v47 = vmul.f32 %v410_v22, %v392_v44 }
 0x11a   : > { %v335_v50 = vpop.permute.xlu1 %334  ;;  %880 = vmatprep.subr.mxu0 %v414_v47  ;;  %v327_v51 = vpop.permute.xlu0 %326 }
 0x11b   : > { %v342_v52 = vsel %vm338_vm3, %v327_v51, %v335_v50  ;;  %v346_v53 = vsel %vm338_vm3, %v335_v50, %v327_v51  ;;  %881 = vmatpush1.msra.mxu0 %v413_v46  ;;  %v630_v50 = vrot.slane %v625_v43, %v1789_v13  ;;  %v634_v51 = vrot.slane %v625_v43, %v1787_v12 }
 0x11c   : > { %v365_v54 = vmul.f32 %v352_v48, %v346_v53  ;;  %v366_v55 = vmul.f32 %v356_v49, %v342_v52 }
 0x11e   : > { %v333_v56 = vpop.permute.xlu1 %332  ;;  %882 = vmatprep.subr.mxu0 %v366_v55  ;;  %v325_v57 = vpop.permute.xlu0 %324 }
 0x11f   : > { %v341_v58 = vsel %vm338_vm3, %v325_v57, %v333_v56  ;;  %v345_v59 = vsel %vm338_vm3, %v333_v56, %v325_v57  ;;  %883 = vmatpush1.msra.mxu0 %v365_v54 }
 0x120   : > { %v363_v60 = vmul.f32 %v352_v48, %v345_v59  ;;  %v364_v61 = vmul.f32 %v356_v49, %v341_v58 }
 0x122   : > { %v331_v62 = vpop.permute.xlu1 %330  ;;  %884 = vmatprep.subr.mxu0 %v364_v61  ;;  %v323_v63 = vpop.permute.xlu0 %322 }
 0x123   : > { %v340_v8 = vsel %vm338_vm3, %v323_v63, %v331_v62  ;;  %v344_v9 = vsel %vm338_vm3, %v331_v62, %v323_v63  ;;  %885 = vmatpush1.msra.mxu0 %v363_v60 }
 0x124   : > { %v361_v10 = vmul.f32 %v352_v48, %v344_v9  ;;  %v362_v14 = vmul.f32 %v356_v49, %v340_v8 }
 0x126   : > { %v329_v16 = vpop.permute.xlu1 %328  ;;  %886 = vmatprep.subr.mxu0 %v362_v14  ;;  %v321_v17 = vpop.permute.xlu0 %320 }
 0x127   : > { %v339_v18 = vsel %vm338_vm3, %v321_v17, %v329_v16  ;;  %v343_v20 = vsel %vm338_vm3, %v329_v16, %v321_v17  ;;  %887 = vmatpush1.msra.mxu0 %v361_v10  ;;  %v571_v17 = vld [vmem:[#allocation9 + $0x5] ss:$8 sm:$0x3] }
 0x128   : > { %v359_v21 = vmul.f32 %v352_v48, %v343_v20  ;;  %v360_v22 = vmul.f32 %v356_v49, %v339_v18 }
 0x12a   : > { %v668_v25 = vpop.permute.xlu1 %667  ;;  %888 = vmatprep.subr.mxu0 %v360_v22  ;;  %v660_v26 = vpop.permute.xlu0 %659 }
 0x12b   : > { %v673_v27 = vsel %vm669_vm4, %v660_v26, %v668_v25  ;;  %v677_v28 = vsel %vm669_vm4, %v668_v25, %v660_v26  ;;  %889 = vmatpush1.msra.mxu0 %v359_v21  ;;  %v576_v25 = vrot.slane %v571_v17, %v1789_v13  ;;  %v580_v26 = vrot.slane %v571_v17, %v1787_v12 }
 0x12c   : > { %v697_v29 = vmul.f32 %v684_v23, %v673_v27  ;;  %v698_v30 = vmul.f32 %v688_v24, %v677_v28 }
 0x12e   : > { %v666_v31 = vpop.permute.xlu1 %665  ;;  %890 = vmatprep.subr.mxu0 %v698_v30  ;;  %v658_v32 = vpop.permute.xlu0 %657 }
 0x12f   : > { %v672_v33 = vsel %vm669_vm4, %v658_v32, %v666_v31  ;;  %v676_v34 = vsel %vm669_vm4, %v666_v31, %v658_v32  ;;  %891 = vmatpush2.msra.mxu0 %v697_v29 }
 0x130   : > { %v695_v35 = vmul.f32 %v684_v23, %v672_v33  ;;  %v696_v36 = vmul.f32 %v688_v24, %v676_v34 }
 0x132   : > { %v664_v37 = vpop.permute.xlu1 %663  ;;  %892 = vmatprep.subr.mxu0 %v696_v36  ;;  %v656_v38 = vpop.permute.xlu0 %655 }
 0x133   : > { %v671_v39 = vsel %vm669_vm4, %v656_v38, %v664_v37  ;;  %v675_v40 = vsel %vm669_vm4, %v664_v37, %v656_v38  ;;  %893 = vmatpush2.msra.mxu0 %v695_v35 }
 0x134   : > { %v693_v41 = vmul.f32 %v684_v23, %v671_v39  ;;  %v694_v42 = vmul.f32 %v688_v24, %v675_v40 }
 0x136   : > { %v662_v44 = vpop.permute.xlu1 %661  ;;  %894 = vmatprep.subr.mxu0 %v694_v42  ;;  %v654_v45 = vpop.permute.xlu0 %653 }
 0x137   : > { %v670_v46 = vsel %vm669_vm4, %v654_v45, %v662_v44  ;;  %v674_v47 = vsel %vm669_vm4, %v662_v44, %v654_v45  ;;  %895 = vmatpush2.msra.mxu0 %v693_v41  ;;  %v733_v45 = vld [vmem:[#allocation9 + $0x10] ss:$8 sm:$0x3] }
 0x138   : > { %v691_v48 = vmul.f32 %v684_v23, %v670_v46  ;;  %v692_v49 = vmul.f32 %v688_v24, %v674_v47 }
 0x13a   : > { %v614_v52 = vpop.permute.xlu1 %613  ;;  %896 = vmatprep.subr.mxu0 %v692_v49  ;;  %v606_v53 = vpop.permute.xlu0 %605 }
 0x13b   : > { %v619_v54 = vsel %vm615_vm5, %v606_v53, %v614_v52  ;;  %v623_v55 = vsel %vm615_vm5, %v614_v52, %v606_v53  ;;  %897 = vmatpush2.msra.mxu0 %v691_v48  ;;  %v738_v52 = vrot.slane %v733_v45, %v1789_v13  ;;  %v742_v53 = vrot.slane %v733_v45, %v1787_v12 }
 0x13c   : > { %v643_v56 = vmul.f32 %v630_v50, %v619_v54  ;;  %v644_v57 = vmul.f32 %v634_v51, %v623_v55 }
 0x13e   : > { %v612_v58 = vpop.permute.xlu1 %611  ;;  %898 = vmatprep.subr.mxu0 %v644_v57  ;;  %v604_v59 = vpop.permute.xlu0 %603 }
 0x13f   : > { %v618_v60 = vsel %vm615_vm5, %v604_v59, %v612_v58  ;;  %v622_v61 = vsel %vm615_vm5, %v612_v58, %v604_v59  ;;  %899 = vmatpush2.msra.mxu0 %v643_v56 }
 0x140   : > { %v641_v62 = vmul.f32 %v630_v50, %v618_v60  ;;  %v642_v63 = vmul.f32 %v634_v51, %v622_v61 }
 0x142   : > { %v610_v8 = vpop.permute.xlu1 %609  ;;  %900 = vmatprep.subr.mxu0 %v642_v63  ;;  %v602_v9 = vpop.permute.xlu0 %601 }
 0x143   : > { %v617_v10 = vsel %vm615_vm5, %v602_v9, %v610_v8  ;;  %v621_v14 = vsel %vm615_vm5, %v610_v8, %v602_v9  ;;  %901 = vmatpush2.msra.mxu0 %v641_v62 }
 0x144   : > { %v639_v15 = vmul.f32 %v630_v50, %v617_v10  ;;  %v640_v16 = vmul.f32 %v634_v51, %v621_v14 }
 0x146   : > { %v608_v18 = vpop.permute.xlu1 %607  ;;  %902 = vmatprep.subr.mxu0 %v640_v16  ;;  %v600_v20 = vpop.permute.xlu0 %599 }
 0x147   : > { %v616_v21 = vsel %vm615_vm5, %v600_v20, %v608_v18  ;;  %v620_v22 = vsel %vm615_vm5, %v608_v18, %v600_v20  ;;  %903 = vmatpush2.msra.mxu0 %v639_v15  ;;  %v763_v20 = vld [vmem:[#allocation8 + $0x10] sm:$0xff] }
 0x148   : > { %v637_v23 = vmul.f32 %v630_v50, %v616_v21  ;;  %v638_v24 = vmul.f32 %v634_v51, %v620_v22 }
 0x14a   : > { %v560_v27 = vpop.permute.xlu1 %559  ;;  %904 = vmatprep.subr.mxu0 %v638_v24  ;;  %v552_v28 = vpop.permute.xlu0 %551 }
 0x14b   : > { %v565_v29 = vsel %vm561_vm6, %v552_v28, %v560_v27  ;;  %v569_v30 = vsel %vm561_vm6, %v560_v27, %v552_v28  ;;  %905 = vmatpush2.msra.mxu0 %v637_v23 }
 0x14c   : > { %v589_v31 = vmul.f32 %v576_v25, %v565_v29  ;;  %v590_v32 = vmul.f32 %v580_v26, %v569_v30 }
 0x14e   : > { %v558_v33 = vpop.permute.xlu1 %557  ;;  %906 = vmatprep.subr.mxu0 %v590_v32  ;;  %v550_v34 = vpop.permute.xlu0 %549 }
 0x14f   : > { %v564_v35 = vsel %vm561_vm6, %v550_v34, %v558_v33  ;;  %v568_v36 = vsel %vm561_vm6, %v558_v33, %v550_v34  ;;  %907 = vmatpush2.msra.mxu0 %v589_v31 }
 0x150   : > { %v587_v37 = vmul.f32 %v576_v25, %v564_v35  ;;  %v588_v38 = vmul.f32 %v580_v26, %v568_v36 }
 0x152   : > { %v556_v39 = vpop.permute.xlu1 %555  ;;  %908 = vmatprep.subr.mxu0 %v588_v38  ;;  %v548_v40 = vpop.permute.xlu0 %547 }
 0x153   : > { %v563_v41 = vsel %vm561_vm6, %v548_v40, %v556_v39  ;;  %v567_v42 = vsel %vm561_vm6, %v556_v39, %v548_v40  ;;  %909 = vmatpush2.msra.mxu0 %v587_v37 }
 0x154   : > { %v585_v43 = vmul.f32 %v576_v25, %v563_v41  ;;  %v586_v44 = vmul.f32 %v580_v26, %v567_v42 }
 0x156   : > { %v554_v46 = vpop.permute.xlu1 %553  ;;  %910 = vmatprep.subr.mxu0 %v586_v44  ;;  %v546_v47 = vpop.permute.xlu0 %545 }
 0x157   : > { %v562_v48 = vsel %vm561_vm6, %v546_v47, %v554_v46  ;;  %v566_v49 = vsel %vm561_vm6, %v554_v46, %v546_v47  ;;  %911 = vmatpush2.msra.mxu0 %v585_v43 }
 0x158   : > { %v583_v50 = vmul.f32 %v576_v25, %v562_v48  ;;  %v584_v51 = vmul.f32 %v580_v26, %v566_v49 }
 0x15a   : > { %v722_v54 = vpop.permute.xlu1 %721  ;;  %912 = vmatprep.subr.mxu0 %v584_v51  ;;  %v714_v55 = vpop.permute.xlu0 %713 }
 0x15b   : > { %v727_v56 = vsel %vm723_vm7, %v714_v55, %v722_v54  ;;  %913 = vmatpush2.msra.mxu0 %v583_v50  ;;  %v731_v57 = vsel %vm723_vm7, %v722_v54, %v714_v55 }
 0x15c   : > { %v752_v58 = vmul.f32 %v742_v53, %v731_v57  ;;  %v751_v59 = vmul.f32 %v738_v52, %v727_v56  ;;  %914 = vmatprep.subr.mxu0 %v1707_v2 }
 0x15d   : > { %915 = vmatpush2.msra.mxu0 %v1701_v0  ;;  %v761_v0 = vld [vmem:[#allocation8] sm:$0xff] }
 0x15e   : > { %v720_v60 = vpop.permute.xlu1 %719  ;;  %959 = vmatprep.subr.mxu1 %v752_v58  ;;  %v712_v13 = vpop.permute.xlu0 %711  ;;  %916 = vmatprep.subr.mxu0 %v1709_v3  ;;  %v765_v3 = vld [vmem:[#allocation8 + $0x20] sm:$0xff] }
 0x15f   : > { %v726_v12 = vsel %vm723_vm7, %v712_v13, %v720_v60  ;;  %v730_v61 = vsel %vm723_vm7, %v720_v60, %v712_v13  ;;  %960 = vmatpush1.msra.mxu1 %v751_v59  ;;  %917 = vmatpush2.msra.mxu0 %v1703_v1 }
 0x160   : > { %v749_v62 = vmul.f32 %v738_v52, %v726_v12  ;;  %v750_v63 = vmul.f32 %v742_v53, %v730_v61  ;;  %918 = vmatprep.subr.mxu0 %v1713_v4 }
 0x161   : > { %919 = vmatpush2.msra.mxu0 %v1715_v5  ;;  %v764_v5 = vld [vmem:[#allocation8 + $0x18] sm:$0xff] }
 0x162   : > { %v718_v2 = vpop.permute.xlu1 %717  ;;  %961 = vmatprep.subr.mxu1 %v750_v63  ;;  %v710_v8 = vpop.permute.xlu0 %709  ;;  %920 = vmatprep.subr.mxu0 %v1719_v6 }
 0x163   : > { %v725_v9 = vsel %vm723_vm7, %v710_v8, %v718_v2  ;;  %v729_v10 = vsel %vm723_vm7, %v718_v2, %v710_v8  ;;  %962 = vmatpush1.msra.mxu1 %v749_v62  ;;  %921 = vmatpush2.msra.mxu0 %v1721_v7  ;;  %v766_v7 = vld [vmem:[#allocation8 + $0x28] sm:$0xff] }
 0x164   : > { %v747_v1 = vmul.f32 %v738_v52, %v725_v9  ;;  %v748_v4 = vmul.f32 %v742_v53, %v729_v10  ;;  %923 = vmatmul.mubr.f32.vlgmr.msra.gmra.mxu0 %v761_v0 }
 0x165   : > { %928 = vmatprep.mubr.f32.mxu0 %v765_v3 }
 0x166   : > { %v716_v14 = vpop.permute.xlu1 %715  ;;  %963 = vmatprep.subr.mxu1 %v748_v4 }
 0x167   : > { %v708_v15 = vpop.permute.xlu0 %707  ;;  %964 = vmatpush1.msra.mxu1 %v747_v1 }
 0x168   : > { %v724_v6 = vsel %vm723_vm7, %v708_v15, %v716_v14  ;;  %v728_v16 = vsel %vm723_vm7, %v716_v14, %v708_v15  ;;  %929 = vmatmul.mubr.f32.gmra.mxu0 %v764_v5 }
 0x169   : > { %v745_v17 = vmul.f32 %v738_v52, %v724_v6  ;;  %v746_v18 = vmul.f32 %v742_v53, %v728_v16 }
 0x16b   : > { %965 = vmatprep.subr.mxu1 %v746_v18 }
 0x16c   : > { %966 = vmatpush1.msra.mxu1 %v745_v17 }
 0x16d   : > { %1166 = vmatmul.mubr.msk.f32.vlgmr.msra.gmra.mxu1 %vm851_vm8, %v763_v20 }
 0x16e   : > { %1005 = vmatprep.mubr.f32.mxu1 %v1467_v19 }
 0x171   : > { %1167 = vmatmul.mubr.msk.f32.gmra.mxu1 %vm851_vm8, %v766_v7 }
 0x173   : > { %v849_v11 = vpop.permute.xlu1 %848 }
 0x174   : > { %v844_v23 = vpop.permute.xlu0 %843 }
 0x224   : > { %v924_v21 = vpop.f32.mrf.mxu0 }
 0x225   : > { %v925_v24 = vadd.f32 %v924_v21, %v844_v23 }
 0x226   : > { %v926_v22 = vpop.f32.mrf.mxu0 }
 0x227   : > { %v927_v27 = vadd.f32 %v926_v22, %v844_v23 }
 0x228   : > { %v930_v25 = vpop.f32.mrf.mxu0 }
 0x229   : > { %v931_v29 = vadd.f32 %v930_v25, %v849_v11 }
 0x22a   : > { %v932_v30 = vpop.f32.mrf.mxu0 }
 0x22b   : > { %v933_v19 = vadd.f32 %v932_v30, %v849_v11 }
 0x22d   : > { %v1001_v26 = vpop.f32.mrf.mxu1 }
 0x22e   : > { %v1002_v28 = vadd.f32 %v1001_v26, %v925_v24 }
 0x22f   : > { %v1003_v31 = vpop.f32.mrf.mxu1 }
 0x230   : > { %v1012_v32 = vmax.f32 %v1002_v28, 0.0  ;;  %v1004_v33 = vadd.f32 %v1003_v31, %v927_v27 }
 0x231   : > { %v1007_v34 = vpop.f32.mrf.mxu1 }
 0x232   : > { %1016 = vst [vmem:[%s311_s15] sm:$0xff] %v1012_v32  ;;  %v1013_v35 = vmax.f32 %v1004_v33, 0.0  ;;  %v1008_v36 = vadd.f32 %v1007_v34, %v931_v29 }
 0x233   : > { %v1009_v37 = vpop.f32.mrf.mxu1 }
 0x234   : > { %1017 = vst [vmem:[%s311_s15 + $0x8] sm:$0xff] %v1013_v35  ;;  %v1014_v38 = vmax.f32 %v1008_v36, 0.0  ;;  %v1010_v39 = vadd.f32 %v1009_v37, %v933_v19 }
 0x236   : > { %1018 = vst [vmem:[%s311_s15 + $0x10] sm:$0xff] %v1014_v38  ;;  %v1015_v40 = vmax.f32 %v1010_v39, 0.0 }
 0x238   : > { %1019 = vst [vmem:[%s311_s15 + $0x18] sm:$0xff] %v1015_v40 }
 0x239   : > { %1386 = shalt.err (!%p1383_p7)
}
 0x23a   : > { %s1387_s8 = scalar_lea.hbm %s1978_s14, 512  ;;  %s1391_s12 = scalar_lea.hbm %s2027_s5, 1024 }
 0x23b   : > { %p1388_p2 = scmp.ne.s32.totalorder %s1978_s14, %s1387_s8  ;;  %p1392_p11 = scmp.lt.s32.totalorder %s1978_s14, %s2027_s5 }
 0x23c   : > { %p1393_p10 = scmp.lt.s32.totalorder %s1391_s12, %s1387_s8 }
 0x23d   : > { %p1389_p0 = pnand %p1388_p2, %p2053_p3 }
 0x23e   : > { %p1394_p6 = por %p1393_p10, %p1392_p11 }
 0x23f   : > { %p1390_p8 = pneg %p1389_p0 }
 0x241   : > { %p1395_p12 = pnand %p1394_p6, %p1390_p8 }
 0x243   : > { %1398 = shalt.err (!%p1395_p12)
}
 0x244   : > { %s1470_s15 = smov 256  }
 0x245   : > { %1188 = dma.vmem_to_hbm [thread:$0]  (%p2053_p3), %s1973_s26, 512, %s1978_s14, %s1021_s24, %s1470_s15, %s1470_s15, %s1461_s11  }
 0x246 PF: > { %s1049_s27 = sand.u32 1, %s1437_s18   ;;  %p2054_p9 = scmp.ne.s32.totalorder %s2038_s25, 0 }
 0x247   : > { %p2055_p13 = scmp.ge.s32.totalorder %s1449_s21, 2  ;;  %s1050_s6 = scalar_lea.sflag [#allocation5], %s1049_s27 }
 0x249   : > { %p1205_p5 = pnand %p2055_p13, %p2054_p9 }
 0x24b   : > { %p1206_p1 = pneg %p1205_p5 }
 0x24d   : > { %1432 = dma.done.wait (%p1206_p1), %s1050_s6, 512  }
 0x24e   : > { %1434 = vsyncadd (%p1206_p1), %s1050_s6, 4294966784  ;;  %p22_p4 = scmp.ge.s32.totalorder %s1576_s17, 4   ;;  %s2056_s18 = smov %s1441_s19 }
 0x24f   : > { %s2057_s19 = smov %s1445_s20  ;;  %s2058_s20 = smov %s1585_s28 }
 0x250   : > { %s2059_s21 = smov %s1576_s17  ;;  %24 = sbr.rel (!%p22_p4) target bundleno = 11 (0xb), region = 113 }
 0x255   :  { %1055 = vsyncpa [#allocation4], 1 }
 0x256   :  { %1057 = vsyncpa [#allocation4 + $0x1], 1 }
 0x257   :  { %1058 = vsyncpa [#allocation7], 1 }
 0x258   :  { %1060 = vsyncpa [#allocation7 + $0x1], 1 }
 0x259   :  { %1061 = vsyncpa [#allocation10], 1 }
 0x25a   :  { %1062 = vsyncpa [#allocation5], 1 }
 0x25b   :  { %1064 = vsyncpa [#allocation5 + $0x1], 1 }

</bundles_post_ra>
